<compile_context>
chip_gen: v5e
topology: v5e:2x2
jax: 0.10.0
libtpu: 0.0.40
codegen_flags: <defaults>
</compile_context>

<pallas_src>
import functools

import jax
import jax.numpy as jnp
from jax.experimental import pallas as pl
from jax.experimental.pallas import tpu as pltpu


def _round_up(x, m):
    return (x + m - 1) // m * m


def _vmem_budget_bytes():
    """~75% of this generation's VMEM (v5e/v6e: 128 MiB, v7x: 64 MiB per TC)."""
    try:
        cap = int(pltpu.get_tpu_info().vmem_capacity_bytes)
    except Exception:
        cap = 64 * 2**20  # conservative fallback (v7x per-TC size)
    return max(32 * 2**20, (3 * cap) // 4)


def _value_mlp_kernel(x_ref, w1_ref, b1_ref, w2_ref, b2_ref, w3_ref, b3_ref,
                      o_ref):
    """One batch tile of the fused 3-layer value MLP, entirely in VMEM.

    x_ref : (tb, D)    obs dtype (unpadded feature dim; cast in-kernel)
    w1_ref: (D, Hp)    compute dtype (bf16 or f32), VMEM-resident
    b1_ref: (1, Hp)    f32
    w2_ref: (Hp, Hp)   compute dtype, VMEM-resident
    b2_ref: (1, Hp)    f32
    w3_ref: (1, Hp)    f32 row vector (layer 3 = VPU mul + XLU lane reduce)
    b3_ref: (1, 1)     f32 scalar in SMEM
    o_ref : (tb, 1)    output dtype
    """
    # In-kernel cast to the MXU compute dtype (saves an HBM round trip that a
    # wrapper-side astype/pad would cost on this mem-bound stream).
    x = x_ref[...].astype(w1_ref.dtype)

    # Layer 1: MXU matmul, f32 accumulation; bias + ReLU on the f32 accumulator.
    h1 = jnp.dot(x, w1_ref[...], preferred_element_type=jnp.float32)
    h1 = jnp.maximum(h1 + b1_ref[...], 0.0)

    # Layer 2: cast activations back to the compute dtype for the MXU.
    h2 = jnp.dot(h1.astype(w2_ref.dtype), w2_ref[...],
                 preferred_element_type=jnp.float32)
    h2 = jnp.maximum(h2 + b2_ref[...], 0.0)

    # Layer 3 (H -> 1): elementwise multiply by the w3 row + lane reduce
    # (VPU + XLU) instead of a single-column MXU matmul.
    v = jnp.sum(h2 * w3_ref[...], axis=-1, keepdims=True) + b3_ref[0, 0]

    o_ref[...] = v.astype(o_ref.dtype)


def prepare_value_function_params(params, compute_dtype=jnp.bfloat16):
    """One-time pad/cast of the weights (hoisted out of the per-call forward).

    Returns (w1p, b1p, w2p, b2p, w3p, b3p):
      w1p: (D, Hp) compute dtype   b1p: (1, Hp) f32
      w2p: (Hp, Hp) compute dtype  b2p: (1, Hp) f32
      w3p: (1, Hp) f32             b3p: (1, 1) f32
    The hidden dim is zero-padded to a 128-lane multiple (zeros are inert in
    the dots); the obs/feature dim D is left unpadded.
    """
    w1, b1, w2, b2, w3, b3 = params
    D, H = w1.shape
    Hp = _round_up(H, 128)
    cdt = compute_dtype
    w1p = jnp.pad(w1.astype(cdt), ((0, 0), (0, Hp - H)))
    w2p = jnp.pad(w2.astype(cdt), ((0, Hp - H), (0, Hp - H)))
    b1p = jnp.pad(b1.astype(jnp.float32).reshape(1, H), ((0, 0), (0, Hp - H)))
    b2p = jnp.pad(b2.astype(jnp.float32).reshape(1, H), ((0, 0), (0, Hp - H)))
    w3p = jnp.pad(w3.astype(jnp.float32).reshape(1, H), ((0, 0), (0, Hp - H)))
    b3p = b3.astype(jnp.float32).reshape(1, 1)
    return (w1p, b1p, w2p, b2p, w3p, b3p)


@functools.partial(jax.jit, static_argnames=("block_b",))
def value_function_forward(obs, prepared_params, *, block_b=1024):
    """Pallas ValueFunction forward. obs: (B, obs_dim) -> (B,)."""
    w1p, b1p, w2p, b2p, w3p, b3p = prepared_params
    B, D = obs.shape
    Hp = w1p.shape[1]
    out_dtype = obs.dtype
    csz = jnp.dtype(w1p.dtype).itemsize
    xsz = jnp.dtype(obs.dtype).itemsize

    # Sublane granularity for the obs/output tile (8 for 32-bit, 16 for 16-bit).
    sub = 16 if xsz < 4 else 8

    # Batch tile: large (amortizes the ~0.35 us per-grid-step overhead), but
    # capped at ceil(B/2) so the grid has >= 2 steps whenever B allows it and
    # both v7x TensorCores get work under dimension_semantics=("parallel",).
    tb = min(_round_up(block_b, sub), max(sub, _round_up(pl.cdiv(B, 2), sub)))

    # Shrink tb only if the VMEM estimate (single-buffered resident weights +
    # double-buffered obs tile + f32 intermediates) exceeds the budget.
    budget = _vmem_budget_bytes()

    def est(t):
        resident = (D * Hp + Hp * Hp) * csz + 3 * Hp * 4      # w1,w2,b1,b2,w3
        streamed = 2 * t * D * xsz + 2 * t * jnp.dtype(out_dtype).itemsize
        inter = 3 * t * Hp * 4                                # h1/h2 f32 + slack
        return resident + streamed + inter

    while tb > sub and est(tb) > budget:
        tb = max(sub, _round_up(tb // 2, sub))

    vmem_limit = int(min(budget, max(32 * 2**20, (3 * est(tb)) // 2)))

    grid = (pl.cdiv(B, tb),)                 # partial last block: masked writes
    const = pl.Buffered(1)                   # constant blocks: no double-buffer

    out = pl.pallas_call(
        _value_mlp_kernel,
        out_shape=jax.ShapeDtypeStruct((B, 1), out_dtype),
        grid_spec=pltpu.PrefetchScalarGridSpec(
            num_scalar_prefetch=0,
            grid=grid,
            in_specs=[
                pl.BlockSpec((tb, D), lambda i: (i, 0)),        # obs (streamed)
                pl.BlockSpec((D, Hp), lambda i: (0, 0), pipeline_mode=const),
                pl.BlockSpec((1, Hp), lambda i: (0, 0), pipeline_mode=const),
                pl.BlockSpec((Hp, Hp), lambda i: (0, 0), pipeline_mode=const),
                pl.BlockSpec((1, Hp), lambda i: (0, 0), pipeline_mode=const),
                pl.BlockSpec((1, Hp), lambda i: (0, 0), pipeline_mode=const),
                pl.BlockSpec(memory_space=pltpu.MemorySpace.SMEM),  # b3 scalar
            ],
            out_specs=pl.BlockSpec((tb, 1), lambda i: (i, 0)),
        ),
        compiler_params=pltpu.CompilerParams(
            dimension_semantics=("parallel",),
            vmem_limit_bytes=vmem_limit),
    )(obs, w1p, b1p, w2p, b2p, w3p, b3p)

    # Squeeze(-1) from the PyTorch module (outside the kernel).
    return out[:, 0]


def init_value_function_params(key, observation_dim, hidden_dim=256,
                               n_hidden=2, dtype=jnp.float32):
    """Orthogonal weights (gain=1.0), zero biases, mirroring orthogonal_net().
    Weights stored as (in_features, out_features) so the kernel computes x @ W."""
    dims = [observation_dim] + [hidden_dim] * n_hidden + [1]
    ortho = jax.nn.initializers.orthogonal(scale=1.0)
    params = []
    for i in range(len(dims) - 1):
        key, sub = jax.random.split(key)
        w = ortho(sub, (dims[i], dims[i + 1]), dtype)
        b = jnp.zeros((dims[i + 1],), dtype)
        params.extend([w, b])
    return tuple(params)


def _reference_forward(obs, params, compute_dtype=jnp.float32):
    """Pure-JAX reference mirroring the kernel's math (same cast pattern)."""
    w1, b1, w2, b2, w3, b3 = params
    c = compute_dtype
    h = jnp.dot(obs.astype(c), w1.astype(c), preferred_element_type=jnp.float32)
    h = jnp.maximum(h + b1.astype(jnp.float32), 0.0)
    h = jnp.dot(h.astype(c), w2.astype(c), preferred_element_type=jnp.float32)
    h = jnp.maximum(h + b2.astype(jnp.float32), 0.0)
    v = jnp.sum(h * w3.astype(jnp.float32).reshape(1, -1), axis=-1)
    return (v + b3.astype(jnp.float32)[0]).astype(obs.dtype)


if __name__ == "__main__":
    key = jax.random.PRNGKey(0)
    obs_dim, hidden_dim, n_hidden = 32, 32, 2
    batch = 8

    k_obs, k_params, k_obs2 = jax.random.split(key, 3)
    obs = jax.random.normal(k_obs, (batch, obs_dim), dtype=jnp.float32)
    params = init_value_function_params(k_params, obs_dim, hidden_dim, n_hidden)

    # f32 compute path: strict check against the reference.
    prep32 = prepare_value_function_params(params, compute_dtype=jnp.float32)
    v32 = jax.block_until_ready(value_function_forward(obs, prep32))
    v32_ref = _reference_forward(obs, params, jnp.float32)
    assert v32.shape == (batch,), v32.shape
    assert jnp.allclose(v32, v32_ref, atol=1e-4, rtol=1e-4), (v32, v32_ref)

    # Ragged batch (exercises the cdiv grid + masked partial last block).
    obs_ragged = jax.random.normal(k_obs2, (batch + 2, obs_dim), dtype=jnp.float32)
    vr = jax.block_until_ready(value_function_forward(obs_ragged, prep32))
    vr_ref = _reference_forward(obs_ragged, params, jnp.float32)
    assert vr.shape == (batch + 2,), vr.shape
    assert jnp.allclose(vr, vr_ref, atol=1e-4, rtol=1e-4), (vr, vr_ref)

    # bf16 compute path (default, faster): reference uses the same casts.
    prepbf = prepare_value_function_params(params, compute_dtype=jnp.bfloat16)
    vbf = jax.block_until_ready(value_function_forward(obs, prepbf))
    vbf_ref = _reference_forward(obs, params, jnp.bfloat16)
    assert vbf.shape == (batch,), vbf.shape
    assert jnp.allclose(vbf, vbf_ref, atol=5e-3, rtol=5e-3), (vbf, vbf_ref)

    print("KERNEL_OK")
</pallas_src>

<mosaic_0001>
module attributes {stable_mosaic.version = 11 : i64} {
  func.func @_value_mlp_kernel(%arg0: i32, %arg1: memref<8x32xf32, #tpu.memory_space<vmem>>, %arg2: memref<32x128xf32, #tpu.memory_space<vmem>>, %arg3: memref<1x128xf32, #tpu.memory_space<vmem>>, %arg4: memref<128x128xf32, #tpu.memory_space<vmem>>, %arg5: memref<1x128xf32, #tpu.memory_space<vmem>>, %arg6: memref<1x128xf32, #tpu.memory_space<vmem>>, %arg7: memref<1x1xf32, #tpu.memory_space<smem>>, %arg8: memref<8x1xf32, #tpu.memory_space<vmem>>) attributes {dimension_semantics = [#tpu.dimension_semantics<parallel>], iteration_bounds = array<i64: 1>, scalar_prefetch = 0 : i64, scratch_operands = 0 : i64, tpu.core_type = #tpu.core_type<tc>, window_params = [{transform_indices = @transform_0, window_bounds = array<i64: 8, 32>}, {pipeline_mode = #tpu.pipeline_mode<synchronous>, transform_indices = @transform_1, window_bounds = array<i64: 32, 128>}, {pipeline_mode = #tpu.pipeline_mode<synchronous>, transform_indices = @transform_2, window_bounds = array<i64: 1, 128>}, {pipeline_mode = #tpu.pipeline_mode<synchronous>, transform_indices = @transform_3, window_bounds = array<i64: 128, 128>}, {pipeline_mode = #tpu.pipeline_mode<synchronous>, transform_indices = @transform_4, window_bounds = array<i64: 1, 128>}, {pipeline_mode = #tpu.pipeline_mode<synchronous>, transform_indices = @transform_5, window_bounds = array<i64: 1, 128>}, {transform_indices = @transform_6, window_bounds = array<i64: 1, 1>}, {transform_indices = @transform_7, window_bounds = array<i64: 8, 1>}]} {
    %c0 = arith.constant 0 : index
    %c0_0 = arith.constant 0 : index
    %0 = vector.load %arg1[%c0, %c0_0] : memref<8x32xf32, #tpu.memory_space<vmem>>, vector<8x32xf32>
    %c0_1 = arith.constant 0 : index
    %c0_2 = arith.constant 0 : index
    %1 = vector.load %arg2[%c0_1, %c0_2] : memref<32x128xf32, #tpu.memory_space<vmem>>, vector<32x128xf32>
    %cst = arith.constant dense<0.000000e+00> : vector<8x128xf32>
    %2 = tpu.matmul %0, %1, %cst {dimension_numbers = #tpu.dot_dimension_numbers<[1], [0], [0], [1], [0, 0, 1, 1], [], []>} : vector<8x32xf32>, vector<32x128xf32>, vector<8x128xf32> -> vector<8x128xf32>
    %c0_3 = arith.constant 0 : index
    %c0_4 = arith.constant 0 : index
    %3 = vector.load %arg3[%c0_3, %c0_4] : memref<1x128xf32, #tpu.memory_space<vmem>>, vector<1x128xf32>
    %4 = vector.broadcast %3 : vector<1x128xf32> to vector<8x128xf32>
    %5 = arith.addf %2, %4 : vector<8x128xf32>
    %cst_5 = arith.constant 0.000000e+00 : f32
    %6 = vector.broadcast %cst_5 : f32 to vector<8x128xf32>
    %7 = arith.maximumf %5, %6 : vector<8x128xf32>
    %c0_6 = arith.constant 0 : index
    %c0_7 = arith.constant 0 : index
    %8 = vector.load %arg4[%c0_6, %c0_7] : memref<128x128xf32, #tpu.memory_space<vmem>>, vector<128x128xf32>
    %cst_8 = arith.constant dense<0.000000e+00> : vector<8x128xf32>
    %9 = tpu.matmul %7, %8, %cst_8 {dimension_numbers = #tpu.dot_dimension_numbers<[1], [0], [0], [1], [0, 0, 1, 1], [], []>} : vector<8x128xf32>, vector<128x128xf32>, vector<8x128xf32> -> vector<8x128xf32>
    %c0_9 = arith.constant 0 : index
    %c0_10 = arith.constant 0 : index
    %10 = vector.load %arg5[%c0_9, %c0_10] : memref<1x128xf32, #tpu.memory_space<vmem>>, vector<1x128xf32>
    %11 = vector.broadcast %10 : vector<1x128xf32> to vector<8x128xf32>
    %12 = arith.addf %9, %11 : vector<8x128xf32>
    %cst_11 = arith.constant 0.000000e+00 : f32
    %13 = vector.broadcast %cst_11 : f32 to vector<8x128xf32>
    %14 = arith.maximumf %12, %13 : vector<8x128xf32>
    %c0_12 = arith.constant 0 : index
    %c0_13 = arith.constant 0 : index
    %15 = vector.load %arg6[%c0_12, %c0_13] : memref<1x128xf32, #tpu.memory_space<vmem>>, vector<1x128xf32>
    %16 = vector.broadcast %15 : vector<1x128xf32> to vector<8x128xf32>
    %17 = arith.mulf %14, %16 : vector<8x128xf32>
    %cst_14 = arith.constant dense<0.000000e+00> : vector<8xf32>
    %18 = vector.multi_reduction <add>, %17, %cst_14 [1] : vector<8x128xf32> to vector<8xf32>
    %19 = vector.shape_cast %18 : vector<8xf32> to vector<8x1xf32>
    %c0_15 = arith.constant 0 : index
    %c0_16 = arith.constant 0 : index
    %20 = memref.load %arg7[%c0_15, %c0_16] : memref<1x1xf32, #tpu.memory_space<smem>>
    %21 = vector.broadcast %20 : f32 to vector<8x1xf32>
    %22 = arith.addf %19, %21 : vector<8x1xf32>
    %c0_17 = arith.constant 0 : index
    %c0_18 = arith.constant 0 : index
    %23 = vector.load %arg8[%c0_17, %c0_18] : memref<8x1xf32, #tpu.memory_space<vmem>>, vector<8x1xf32>
    tpu.vector_store %arg8[%c0_17, %c0_18], %22 {strides = array<i32>} : memref<8x1xf32, #tpu.memory_space<vmem>>, vector<8x1xf32>,
    return
  }
  func.func @transform_0(%arg0: i32) -> (i32, i32) {
    %c0_i32 = arith.constant 0 : i32
    %c0_i32_0 = arith.constant 0 : i32
    return %arg0, %c0_i32 : i32, i32
  }
  func.func @transform_1(%arg0: i32) -> (i32, i32) {
    %c0_i32 = arith.constant 0 : i32
    %c0_i32_0 = arith.constant 0 : i32
    %c0_i32_1 = arith.constant 0 : i32
    return %c0_i32, %c0_i32_0 : i32, i32
  }
  func.func @transform_2(%arg0: i32) -> (i32, i32) {
    %c0_i32 = arith.constant 0 : i32
    %c0_i32_0 = arith.constant 0 : i32
    %c0_i32_1 = arith.constant 0 : i32
    return %c0_i32, %c0_i32_0 : i32, i32
  }
  func.func @transform_3(%arg0: i32) -> (i32, i32) {
    %c0_i32 = arith.constant 0 : i32
    %c0_i32_0 = arith.constant 0 : i32
    %c0_i32_1 = arith.constant 0 : i32
    return %c0_i32, %c0_i32_0 : i32, i32
  }
  func.func @transform_4(%arg0: i32) -> (i32, i32) {
    %c0_i32 = arith.constant 0 : i32
    %c0_i32_0 = arith.constant 0 : i32
    %c0_i32_1 = arith.constant 0 : i32
    return %c0_i32, %c0_i32_0 : i32, i32
  }
  func.func @transform_5(%arg0: i32) -> (i32, i32) {
    %c0_i32 = arith.constant 0 : i32
    %c0_i32_0 = arith.constant 0 : i32
    %c0_i32_1 = arith.constant 0 : i32
    return %c0_i32, %c0_i32_0 : i32, i32
  }
  func.func @transform_6(%arg0: i32) -> (i32, i32) {
    %c0_i32 = arith.constant 0 : i32
    %c0_i32_0 = arith.constant 0 : i32
    %c0_i32_1 = arith.constant 0 : i32
    return %c0_i32, %c0_i32_0 : i32, i32
  }
  func.func @transform_7(%arg0: i32) -> (i32, i32) {
    %c0_i32 = arith.constant 0 : i32
    %c0_i32_0 = arith.constant 0 : i32
    return %arg0, %c0_i32 : i32, i32
  }
}

</mosaic_0001>

<bundles_post_ra>
// kernel: value_function_forward.1
= control target key start
LH: loop header
LB: loop body
LE: loop exit
PB: predicated region body
PF: predicated region fallthrough
CT: control target
= control target key end

     0   :  { %13 = vsyncpa [#allocation4], 0  ;;  %s319_s0 = inlined_call_operand.hbm [shape: f32[8,32], index: 0, kind: input, shape index: {}]   ;;  %s320_s1 = inlined_call_operand.hbm [shape: f32[32,128], index: 1, kind: input, shape index: {}]   ;;  %s321_s2 = inlined_call_operand.vmem [shape: f32[1,128], index: 2, kind: input, shape index: {}]   ;;  %s322_s3 = inlined_call_operand.hbm [shape: f32[128,128], index: 3, kind: input, shape index: {}]   ;;  %s323_s4 = inlined_call_operand.vmem [shape: f32[1,128], index: 4, kind: input, shape index: {}]   ;;  %s324_s5 = inlined_call_operand.vmem [shape: f32[1,128], index: 5, kind: input, shape index: {}]   ;;  %s325_s6 = inlined_call_operand.<no memory space> [shape: f32[1,1], index: 6, kind: input, shape index: {}]   ;;  %s326_s7 = inlined_call_operand.vmem [shape: f32[8,1], index: 7, kind: output, shape index: {}]  }
   0x1   :  { %14 = vsyncpa [#allocation6], 0  ;;  %s30_s26 = sshll.u32 %s320_s1, 4  ;;  %s250_s27 = smov [#allocation5]   ;;  %s31_s26 = int_to_ptr.hbm [resolvable:$true] %s30_s26 }
   0x2   :  { %s32_s28 = sshll.u32 %s250_s27, 4  ;;  %s20_s8 = sshll.u32 %s319_s0, 4  ;;  %s33_s28 = int_to_ptr.vmem [resolvable:$true] %s32_s28  ;;  %s21_s8 = int_to_ptr.hbm [resolvable:$true] %s20_s8 }
   0x3   :  { %s251_s9 = smov 128   ;;  %s252_s10 = smov 8  }
   0x4   :  { %38 = dma.hbm_to_vmem [thread:$0]  %s31_s26, 512, %s33_s28, [#allocation6], %s251_s9, %s251_s9, %s252_s10  }
   0x5   :  { %s253_s11 = smov [#allocation3]   ;;  %s45_s15 = sshll.u32 %s322_s3, 4  ;;  %s46_s15 = int_to_ptr.hbm [resolvable:$true] %s45_s15 }
   0x6   :  { %s22_s12 = sshll.u32 %s253_s11, 4  ;;  %s254_s1 = smov [#allocation7]   ;;  %s23_s12 = int_to_ptr.vmem [resolvable:$true] %s22_s12 }
   0x7   :  { %25 = dma.hbm_to_vmem [thread:$0]  %s21_s8, 128, %s23_s12, [#allocation4]  }
   0x8   :  { %s47_s16 = sshll.u32 %s254_s1, 4  ;;  %s48_s16 = int_to_ptr.vmem [resolvable:$true] %s47_s16 }
   0x9   :  { %53 = dma.hbm_to_vmem [thread:$0]  %s46_s15, 2048, %s48_s16, [#allocation6], %s251_s9, %s251_s9, %s252_s10  }
   0xa   :  { %246 = dma.done.wait [#allocation4], 128  }
   0xb   :  { %247 = vsyncadd [#allocation4], 4294967168 }
   0xc   :  { %248 = dma.done.wait [#allocation6], 2560  }
   0xd   :  { %249 = vsyncadd [#allocation6], 4294964736  ;;  %v76_v0 = vld [vmem:[#allocation5 + $0x18] sm:$0xff]  ;;  %v75_v1 = vld [vmem:[#allocation5 + $0x10] sm:$0xff]  ;;  %vm81_vm0 = vcmask 261120   ;;  %v155_v31 = vstv %s325_s6  ;;  %vm157_vm1 = vcmask 7168  }
   0xe   :  { %97 = vmatpush.msra.mxu0 %v76_v0  ;;  %v121_v2 = vld [vmem:[#allocation7 + $0x78] sm:$0xff]  ;;  %v74_v3 = vld [vmem:[#allocation5 + $0x8] sm:$0xff]  ;;  %v120_v4 = vld [vmem:[#allocation7 + $0x70] sm:$0xff] }
   0xf   :  { %126 = vmatpush.msra.mxu1 %v121_v2  ;;  %v119_v5 = vld [vmem:[#allocation7 + $0x68] sm:$0xff]  ;;  %v73_v6 = vld [vmem:[#allocation5] sm:$0xff]  ;;  %v72_v7 = vld [vmem:[#allocation3] sm:$0xff] }
  0x10   :  { %98 = vmatpush.msra.mxu0 %v75_v1  ;;  %v118_v8 = vld [vmem:[#allocation7 + $0x60] sm:$0xff]  ;;  %v117_v9 = vld [vmem:[#allocation7 + $0x58] sm:$0xff]  ;;  %v116_v10 = vld [vmem:[#allocation7 + $0x50] sm:$0xff] }
  0x11   :  { %127 = vmatpush.msra.mxu1 %v120_v4  ;;  %v115_v11 = vld [vmem:[#allocation7 + $0x48] sm:$0xff]  ;;  %v114_v12 = vld [vmem:[#allocation7 + $0x40] sm:$0xff]  ;;  %v113_v13 = vld [vmem:[#allocation7 + $0x38] sm:$0xff] }
  0x12   :  { %99 = vmatpush.msra.mxu0 %v74_v3  ;;  %v112_v14 = vld [vmem:[#allocation7 + $0x30] sm:$0xff]  ;;  %v111_v15 = vld [vmem:[#allocation7 + $0x28] sm:$0xff]  ;;  %v110_v16 = vld [vmem:[#allocation7 + $0x20] sm:$0xff] }
  0x13   :  { %128 = vmatpush.msra.mxu1 %v119_v5  ;;  %v109_v17 = vld [vmem:[#allocation7 + $0x18] sm:$0xff]  ;;  %v108_v18 = vld [vmem:[#allocation7 + $0x10] sm:$0xff]  ;;  %v107_v19 = vld [vmem:[#allocation7 + $0x8] sm:$0xff] }
  0x14   :  { %100 = vmatpush.msra.mxu0 %v73_v6  ;;  %v106_v20 = vld [vmem:[#allocation7] sm:$0xff]  ;;  %v171_v21 = vld [vmem:[%s321_s2] ss:$0 sm:$0xff] }
  0x15   :  { %165 = vmatmul.msk.f32.vlgmr.msra.gmra.mxu0 %vm81_vm0, %v72_v7  ;;  %129 = vmatpush.msra.mxu1 %v118_v8  ;;  %v172_v25 = vld [vmem:[%s323_s4] ss:$0 sm:$0xff] }
  0x16   :  { %v173_v28 = vld [vmem:[%s324_s5] ss:$0 sm:$0xff] }
  0x17   :  { %130 = vmatpush.msra.mxu1 %v117_v9 }
  0x19   :  { %131 = vmatpush.msra.mxu1 %v116_v10 }
  0x1b   :  { %132 = vmatpush.msra.mxu1 %v115_v11 }
  0x1d   :  { %133 = vmatpush.msra.mxu1 %v114_v12 }
  0x1f   :  { %134 = vmatpush.msra.mxu1 %v113_v13 }
  0x21   :  { %135 = vmatpush.msra.mxu1 %v112_v14 }
  0x23   :  { %136 = vmatpush.msra.mxu1 %v111_v15 }
  0x25   :  { %137 = vmatpush.msra.mxu1 %v110_v16 }
  0x27   :  { %138 = vmatpush.msra.mxu1 %v109_v17 }
  0x29   :  { %139 = vmatpush.msra.mxu1 %v108_v18 }
  0x2b   :  { %140 = vmatpush.msra.mxu1 %v107_v19 }
  0x2d   :  { %141 = vmatpush.msra.mxu1 %v106_v20 }
  0x92   :  { %v102_v22 = vpop.f32.mrf.mxu0 }
  0x93   :  { %v103_v23 = vadd.f32 %v171_v21, %v102_v22 }
  0x95   :  { %v105_v24 = vmax.f32 %v103_v23, 0.0 }
  0x97   :  { %142 = vmatmul.f32.vlgmr.msra.gmra.mxu1 %v105_v24 }
 0x114   :  { %v143_v26 = vpop.f32.mrf.mxu1 }
 0x115   :  { %v144_v27 = vadd.f32 %v172_v25, %v143_v26 }
 0x117   :  { %v146_v29 = vmax.f32 %v144_v27, 0.0 }
 0x119   :  { %v151_v30 = vmul.f32 %v173_v28, %v146_v29 }
 0x11b   :  { %152 = vadd.xlane.f32.xlu0 %v151_v30 }
 0x18e   :  { %v153_v32 = vpop.xlane.xlu0 %152 }
 0x18f   :  { %v156_v33 = vadd.f32 %v155_v31, %v153_v32 }
 0x191   :  { %158 = vst.msk [vmem:[%s326_s7] sm:$0xff] %vm157_vm1, %v156_v33 }
 0x192   :  { %163 = vsyncpa [#allocation4], 1 }
 0x193   :  { %164 = vsyncpa [#allocation6], 1 }

</bundles_post_ra>
